<compile_context>
chip_gen: v7x
topology: tpu7x:2x2x1
jax: 0.10.0
libtpu: 0.0.40
codegen_flags: <defaults>
</compile_context>

<pallas_src>
import functools

import jax
import jax.numpy as jnp
from jax.experimental import pallas as pl
from jax.experimental.pallas import tpu as pltpu

_SUBLANE = 8


def _round_up(n, m):
    return ((n + m - 1) // m) * m


def _mlp_kernel(x_ref, w1_ref, b1_ref, w2_ref, b2_ref, o_ref):
    # fc1: (tm, in) @ (in, H) -> f32 accumulation on the MXU.
    z1 = jnp.dot(x_ref[...], w1_ref[...], preferred_element_type=jnp.float32)
    z1 = z1 + b1_ref[...]                      # (tm, H) + (1, H) broadcast, f32
    h = jax.nn.sigmoid(z1)                     # exp/recip -> EUP slot, f32
    # fc2: (tm, H) @ (H, C) -> f32.
    z2 = jnp.dot(h.astype(w2_ref.dtype), w2_ref[...],
                 preferred_element_type=jnp.float32)
    o_ref[...] = (z2 + b2_ref[...]).astype(o_ref.dtype)   # narrow (tm, C) store


def prepare_params(w1, b1, w2, b2, *, compute_dtype=jnp.bfloat16):
    """One-time parameter prep (hoisted off the per-call hot path).

    Inputs follow the PyTorch nn.Linear convention:
      w1: (hidden, in), b1: (hidden,), w2: (classes, hidden), b2: (classes,).
    Returns (w1_t, b1_r, w2_t, b2_r): weights transposed to (in, out) in
    compute_dtype, biases as f32 (1, out) rows.  No lane padding — blocks use
    full array dims, and the bias add / sigmoid stay in f32 regardless.
    """
    w1_t = jnp.asarray(w1.T, compute_dtype)
    w2_t = jnp.asarray(w2.T, compute_dtype)
    b1_r = jnp.asarray(b1, jnp.float32).reshape(1, -1)
    b2_r = jnp.asarray(b2, jnp.float32).reshape(1, -1)
    return w1_t, b1_r, w2_t, b2_r


def _choose_batch_tile(B, block_b):
    """Pick (tm, b_pad, n_tiles): keep padding small, keep >=2 tiles when B
    allows it (so v7x's second TensorCore gets work), respect block_b cap."""
    min_tiles = min(2, max(B // _SUBLANE, 1))
    n_tiles = max(pl.cdiv(B, block_b), min_tiles)
    tm = _round_up(pl.cdiv(B, n_tiles), _SUBLANE)
    b_pad = _round_up(B, tm)
    return tm, b_pad, b_pad // tm


def nn_model_forward(x, w1_t, b1, w2_t, b2, *, block_b=1024, out_dtype=jnp.float32):
    """x: (B, in) f32. Params from prepare_params. Returns (B, num_classes)."""
    B, in_f = x.shape
    hidden = w1_t.shape[1]
    num_classes = w2_t.shape[1]

    tm, b_pad, n_tiles = _choose_batch_tile(B, block_b)

    # Stream x in the MXU compute dtype (halves its DMA bytes when bf16).
    x = x.astype(w1_t.dtype)
    if b_pad != B:
        x = jnp.pad(x, ((0, b_pad - B), (0, 0)))

    flops = 2 * b_pad * (in_f * hidden + hidden * num_classes)
    bytes_accessed = (
        x.size * x.dtype.itemsize
        + w1_t.size * w1_t.dtype.itemsize
        + w2_t.size * w2_t.dtype.itemsize
        + (b1.size + b2.size) * 4
        + b_pad * num_classes * jnp.dtype(out_dtype).itemsize
    )

    out = pl.pallas_call(
        _mlp_kernel,
        out_shape=jax.ShapeDtypeStruct((b_pad, num_classes), out_dtype),
        grid=(n_tiles,),
        in_specs=[
            pl.BlockSpec((tm, in_f), lambda i: (i, 0)),            # x tile (pipelined)
            pl.BlockSpec((in_f, hidden), lambda i: (0, 0)),        # W1 resident
            pl.BlockSpec((1, hidden), lambda i: (0, 0)),           # b1 resident
            pl.BlockSpec((hidden, num_classes), lambda i: (0, 0)), # W2 resident
            pl.BlockSpec((1, num_classes), lambda i: (0, 0)),      # b2 resident
        ],
        out_specs=pl.BlockSpec((tm, num_classes), lambda i: (i, 0)),
        compiler_params=pltpu.CompilerParams(
            # Batch tiles are independent -> shard across v7x's two TCs.
            dimension_semantics=("parallel",)),
        cost_estimate=pl.CostEstimate(
            flops=flops,
            transcendentals=b_pad * hidden,
            bytes_accessed=bytes_accessed),
    )(x, w1_t, b1, w2_t, b2)

    # Cheap row slice only when the batch had to be padded.
    return out if b_pad == B else out[:B]


def _init_linear(key, out_features, in_features):
    # Deterministic init mimicking nn.Linear default: U(-1/sqrt(in), 1/sqrt(in)).
    kw, kb = jax.random.split(key)
    bound = 1.0 / jnp.sqrt(jnp.float32(in_features))
    w = jax.random.uniform(kw, (out_features, in_features), jnp.float32, -bound, bound)
    b = jax.random.uniform(kb, (out_features,), jnp.float32, -bound, bound)
    return w, b


if __name__ == "__main__":
    batch = 8
    input_size = 16
    hidden_size = 32
    num_classes = 10

    key = jax.random.PRNGKey(0)
    kx, k1, k2, kx2 = jax.random.split(key, 4)

    x = jax.random.normal(kx, (batch, input_size), jnp.float32)
    w1, b1 = _init_linear(k1, hidden_size, input_size)
    w2, b2 = _init_linear(k2, num_classes, hidden_size)

    # Plain-JAX reference (PyTorch forward semantics).
    ref = jax.nn.sigmoid(x @ w1.T + b1) @ w2.T + b2

    fwd = jax.jit(functools.partial(nn_model_forward))

    # Exact f32 path (works on all chips): tight tolerance.
    p32 = prepare_params(w1, b1, w2, b2, compute_dtype=jnp.float32)
    out32 = jax.block_until_ready(fwd(x, *p32))
    assert out32.shape == (batch, num_classes)
    assert jnp.allclose(out32, ref, atol=1e-5, rtol=1e-5)

    # Default bf16 MXU operands (all generations); f32 accumulation + elementwise.
    pbf16 = prepare_params(w1, b1, w2, b2)
    outbf16 = jax.block_until_ready(fwd(x, *pbf16))
    assert outbf16.shape == (batch, num_classes)
    assert jnp.allclose(outbf16, ref, atol=5e-2, rtol=5e-2)

    # Larger, awkward batch: exercises the multi-tile grid + row-padding path.
    big_b = 300
    xb = jax.random.normal(kx2, (big_b, input_size), jnp.float32)
    refb = jax.nn.sigmoid(xb @ w1.T + b1) @ w2.T + b2
    outb = jax.block_until_ready(fwd(xb, *p32))
    assert outb.shape == (big_b, num_classes)
    assert jnp.allclose(outb, refb, atol=1e-5, rtol=1e-5)

    print("KERNEL_OK")
</pallas_src>

<mosaic_0001>
module attributes {stable_mosaic.version = 11 : i64} {
  func.func @_mlp_kernel(%arg0: i32, %arg1: memref<8x16xf32, #tpu.memory_space<vmem>>, %arg2: memref<16x32xf32, #tpu.memory_space<vmem>>, %arg3: memref<1x32xf32, #tpu.memory_space<vmem>>, %arg4: memref<32x10xf32, #tpu.memory_space<vmem>>, %arg5: memref<1x10xf32, #tpu.memory_space<vmem>>, %arg6: memref<8x10xf32, #tpu.memory_space<vmem>>) attributes {dimension_semantics = [#tpu.dimension_semantics<parallel>], iteration_bounds = array<i64: 1>, scalar_prefetch = 0 : i64, scratch_operands = 0 : i64, tpu.core_type = #tpu.core_type<tc>, window_params = [{transform_indices = @transform_0, window_bounds = array<i64: 8, 16>}, {pipeline_mode = #tpu.pipeline_mode<synchronous>, transform_indices = @transform_1, window_bounds = array<i64: 16, 32>}, {pipeline_mode = #tpu.pipeline_mode<synchronous>, transform_indices = @transform_2, window_bounds = array<i64: 1, 32>}, {pipeline_mode = #tpu.pipeline_mode<synchronous>, transform_indices = @transform_3, window_bounds = array<i64: 32, 10>}, {pipeline_mode = #tpu.pipeline_mode<synchronous>, transform_indices = @transform_4, window_bounds = array<i64: 1, 10>}, {transform_indices = @transform_5, window_bounds = array<i64: 8, 10>}]} {
    %c0 = arith.constant 0 : index
    %c0_0 = arith.constant 0 : index
    %0 = vector.load %arg1[%c0, %c0_0] : memref<8x16xf32, #tpu.memory_space<vmem>>, vector<8x16xf32>
    %c0_1 = arith.constant 0 : index
    %c0_2 = arith.constant 0 : index
    %1 = vector.load %arg2[%c0_1, %c0_2] : memref<16x32xf32, #tpu.memory_space<vmem>>, vector<16x32xf32>
    %cst = arith.constant dense<0.000000e+00> : vector<8x32xf32>
    %2 = tpu.matmul %0, %1, %cst {dimension_numbers = #tpu.dot_dimension_numbers<[1], [0], [0], [1], [0, 0, 1, 1], [], []>} : vector<8x16xf32>, vector<16x32xf32>, vector<8x32xf32> -> vector<8x32xf32>
    %c0_3 = arith.constant 0 : index
    %c0_4 = arith.constant 0 : index
    %3 = vector.load %arg3[%c0_3, %c0_4] : memref<1x32xf32, #tpu.memory_space<vmem>>, vector<1x32xf32>
    %4 = vector.broadcast %3 : vector<1x32xf32> to vector<8x32xf32>
    %5 = arith.addf %2, %4 : vector<8x32xf32>
    %6 = arith.negf %5 : vector<8x32xf32>
    %7 = math.exp %6 : vector<8x32xf32>
    %cst_5 = arith.constant 1.000000e+00 : f32
    %8 = vector.broadcast %cst_5 : f32 to vector<8x32xf32>
    %9 = arith.addf %8, %7 : vector<8x32xf32>
    %10 = arith.divf %8, %9 : vector<8x32xf32>
    %c0_6 = arith.constant 0 : index
    %c0_7 = arith.constant 0 : index
    %11 = vector.load %arg4[%c0_6, %c0_7] : memref<32x10xf32, #tpu.memory_space<vmem>>, vector<32x10xf32>
    %cst_8 = arith.constant dense<0.000000e+00> : vector<8x10xf32>
    %12 = tpu.matmul %10, %11, %cst_8 {dimension_numbers = #tpu.dot_dimension_numbers<[1], [0], [0], [1], [0, 0, 1, 1], [], []>} : vector<8x32xf32>, vector<32x10xf32>, vector<8x10xf32> -> vector<8x10xf32>
    %c0_9 = arith.constant 0 : index
    %c0_10 = arith.constant 0 : index
    %13 = vector.load %arg5[%c0_9, %c0_10] : memref<1x10xf32, #tpu.memory_space<vmem>>, vector<1x10xf32>
    %14 = vector.broadcast %13 : vector<1x10xf32> to vector<8x10xf32>
    %15 = arith.addf %12, %14 : vector<8x10xf32>
    %c0_11 = arith.constant 0 : index
    %c0_12 = arith.constant 0 : index
    %16 = vector.load %arg6[%c0_11, %c0_12] : memref<8x10xf32, #tpu.memory_space<vmem>>, vector<8x10xf32>
    tpu.vector_store %arg6[%c0_11, %c0_12], %15 {strides = array<i32>} : memref<8x10xf32, #tpu.memory_space<vmem>>, vector<8x10xf32>,
    return
  }
  func.func @transform_0(%arg0: i32) -> (i32, i32) {
    %c0_i32 = arith.constant 0 : i32
    %c0_i32_0 = arith.constant 0 : i32
    return %arg0, %c0_i32 : i32, i32
  }
  func.func @transform_1(%arg0: i32) -> (i32, i32) {
    %c0_i32 = arith.constant 0 : i32
    %c0_i32_0 = arith.constant 0 : i32
    %c0_i32_1 = arith.constant 0 : i32
    return %c0_i32, %c0_i32_0 : i32, i32
  }
  func.func @transform_2(%arg0: i32) -> (i32, i32) {
    %c0_i32 = arith.constant 0 : i32
    %c0_i32_0 = arith.constant 0 : i32
    %c0_i32_1 = arith.constant 0 : i32
    return %c0_i32, %c0_i32_0 : i32, i32
  }
  func.func @transform_3(%arg0: i32) -> (i32, i32) {
    %c0_i32 = arith.constant 0 : i32
    %c0_i32_0 = arith.constant 0 : i32
    %c0_i32_1 = arith.constant 0 : i32
    return %c0_i32, %c0_i32_0 : i32, i32
  }
  func.func @transform_4(%arg0: i32) -> (i32, i32) {
    %c0_i32 = arith.constant 0 : i32
    %c0_i32_0 = arith.constant 0 : i32
    %c0_i32_1 = arith.constant 0 : i32
    return %c0_i32, %c0_i32_0 : i32, i32
  }
  func.func @transform_5(%arg0: i32) -> (i32, i32) {
    %c0_i32 = arith.constant 0 : i32
    %c0_i32_0 = arith.constant 0 : i32
    return %arg0, %c0_i32 : i32, i32
  }
}

</mosaic_0001>

<bundles_post_ra>
// kernel: nn_model_forward.1
= control target key start
LH: loop header
LB: loop body
LE: loop exit
PB: predicated region body
PF: predicated region fallthrough
CT: control target
= control target key end

     0   :  { %v284_v2 = vmov 0.0|0.0   ;;  %vm285_vm0 = vmmov 0   ;;  %v286_v4 = vmov 0.0   ;;  %s357_s0 = inlined_call_operand.vmem [shape: f32[8,16], index: 0, kind: input, shape index: {}]   ;;  %s358_s1 = inlined_call_operand.vmem [shape: f32[16,32], index: 1, kind: input, shape index: {}]   ;;  %s359_s2 = inlined_call_operand.vmem [shape: f32[1,32], index: 2, kind: input, shape index: {}]   ;;  %s360_s3 = inlined_call_operand.vmem [shape: f32[32,10], index: 3, kind: input, shape index: {}]   ;;  %s361_s4 = inlined_call_operand.vmem [shape: f32[1,10], index: 4, kind: input, shape index: {}]   ;;  %s362_s5 = inlined_call_operand.hbm [shape: f32[8,10], index: 5, kind: output, shape index: {}]  }
   0x1   :  { %v22_v0 = vld [vmem:[%s358_s1] sm:$0xff]  ;;  %v23_v1 = vld [vmem:[%s358_s1 + $0x8] sm:$0xff]  ;;  %243 = vmatprep.subr.bf16.mxu0 %v284_v2  ;;  %229 = vmatprep.mubr.msk.f32.mxu0 %vm285_vm0, %v286_v4 }
   0x2   :  { %v244_v3 = vpack.c.bf16 %v23_v1, %v22_v0 }
   0x3   :  { %10 = vsyncpa [#allocation3], 0  ;;  %246 = vmatprep.subr.bf16.mxu1 %v284_v2  ;;  %240 = vmatprep.mubr.msk.f32.mxu1 %vm285_vm0, %v286_v4  ;;  %v21_v5 = vld [vmem:[%s357_s0] sm:$0xff]  ;;  %vm31_vm1 = vcmask 130048   ;;  %v112_v7 = vld [vmem:[%s360_s3 + $0x8] sm:$0xff]  ;;  %vm122_vm2 = vcmask 261120  }
   0x4   :  { %245 = vmatpush3.bf16.msra.mxu0 %v244_v3  ;;  %v111_v6 = vld [vmem:[%s360_s3] sm:$0xff]  ;;  %v113_v8 = vld [vmem:[%s360_s3 + $0x10] sm:$0xff]  ;;  %v114_v10 = vld [vmem:[%s360_s3 + $0x18] sm:$0xff]  ;;  %s287_s8 = smov [#allocation2]   ;;  %vm196_vm3 = vcmask 80896  }
   0x5   :  { %v247_v9 = vpack.c.bf16 %v112_v7, %v111_v6  ;;  %v250_v11 = vpack.c.bf16 %v114_v10, %v113_v8  ;;  %v212_v12 = vld [vmem:[%s359_s2] ss:$0 sm:$0xff]  ;;  %s204_s9 = sshll.u32 %s287_s8, 4  ;;  %s205_s9 = int_to_ptr.vmem [resolvable:$true] %s204_s9 }
   0x6   :  { %v215_v20 = vld [vmem:[%s361_s4] ss:$0 sm:$0xff]  ;;  %s260_s2 = scalar_lea.vmem %s205_s9, 128  ;;  %p265_p1 = scmp.lt.s32.totalorder %s205_s9, %s205_s9 }
   0x7   :  { %230 = vmatmul.mubr.msk.f32.vlgmr.msra.gmra.mrb[0].mxu0 %vm31_vm1, %v21_v5  ;;  %248 = vmatpush3.bf16.msra.mxu1 %v247_v9  ;;  %p261_p0 = scmp.ne.s32.totalorder %s205_s9, %s260_s2  ;;  %p266_p2 = scmp.lt.s32.totalorder %s260_s2, %s260_s2 }
   0x8   :  { %249 = vmatprep.subr.bf16.mxu1 %v284_v2 }
   0x9   :  { %p267_p3 = por %p266_p2, %p265_p1 }
   0xb   :  { %251 = vmatpush3.bf16.msra.mxu1 %v250_v11  ;;  %p268_p4 = pnand %p267_p3, %p261_p0 }
  0xda   :  { %v101_v13 = vpop.f32.mrb[0].mxu0 }
  0xdb   :  { %v102_v14 = vadd.f32 %v212_v12, %v101_v13  ;;  %v231_v15 = vpop.f32.mrb[1].mxu0 }
  0xdd   :  { %v214_v16 = vmul.f32 -1.442695, %v102_v14 }
  0xdf   :  { %256 = vpow2.f32 %v214_v16 }
  0xe9   :  { %v257_v17 = vpop.eup %256 }
  0xea   :  { %v108_v18 = vadd.f32 1.0, %v257_v17 }
  0xec   :  { %258 = vrcp.f32 %v108_v18 }
  0xf6   :  { %v259_v19 = vpop.eup %258 }
  0xf7   :  { %241 = vmatmul.mubr.msk.f32.vlgmr.msra.gmra.mrb[0].mxu1 %vm122_vm2, %v259_v19 }
 0x1ca   :  { %v192_v21 = vpop.f32.mrb[0].mxu1 }
 0x1cb   :  { %v193_v22 = vadd.f32 %v215_v20, %v192_v21  ;;  %v242_v23 = vpop.f32.mrb[1].mxu1 }
 0x1cd   :  { %197 = vst.msk [vmem:[#allocation2] sm:$0xff] %vm196_vm3, %v193_v22 }
 0x1ce   :  { %271 = shalt.err (!%p268_p4)
}
 0x1cf   :  { %s272_s12 = scalar_lea.hbm %s362_s5, 128 }
 0x1d0   :  { %p273_p5 = scmp.ne.s32.totalorder %s362_s5, %s272_s12  ;;  %p276_p6 = scmp.lt.u32.totalorder %s272_s12, %s362_s5 }
 0x1d2   :  { %p278_p7 = pnand %p276_p6, %p273_p5 }
 0x1d4   :  { %281 = shalt.err (!%p278_p7)
}
 0x1d5   :  { %207 = dma.vmem_to_hbm [thread:$0]  %s205_s9, 128, %s362_s5, [#allocation3]  }
 0x1d6   :  { %282 = dma.done.wait [#allocation3], 128  }
 0x1d7   :  { %283 = vsyncadd [#allocation3], 4294967168 }
 0x1d8   :  { %211 = vsyncpa [#allocation3], 1 }

</bundles_post_ra>
